<compile_context>
chip_gen: v7x
topology: tpu7x:2x2x1
jax: 0.10.0
libtpu: 0.0.40
codegen_flags: <defaults>
</compile_context>

<pallas_src>
import functools
import jax
import jax.numpy as jnp
from jax.experimental import pallas as pl
from jax.experimental.pallas import tpu as pltpu


def _merge_kernel(x_ref, W_ref, B_ref, wf_ref, bf_ref, o_ref, *, n_lin):
    # x_ref: (tm, 2n) bf16 tile of the paired-token row view
    x_bf = x_ref[...]                                   # bf16
    h = x_bf                                            # bf16 feeds the MXU natively

    # n_layers * 3 stacked Linear + ELU (static-unrolled hot path)
    for l in range(n_lin):
        acc = jnp.dot(h, W_ref[l],                      # bf16 x bf16 -> f32 accum
                      preferred_element_type=jnp.float32)
        acc = acc + B_ref[l].astype(jnp.float32)
        # ELU(alpha=1). torch uses expm1 on the negative branch; exp(x)-1 is
        # within bf16 rounding of that and lowers cleanly to the EUP.
        acc = jnp.where(acc > 0, acc, jnp.exp(acc) - 1.0)
        h = acc.astype(jnp.bfloat16)                    # bf16 activations between layers

    # Final Linear(2n -> 1): N=1 would waste a full MXU pass + FIFO drain, so
    # do it as a VPU multiply + lane reduction instead.
    hf = h.astype(jnp.float32)
    wf_row = wf_ref[...].astype(jnp.float32)            # (1, 2n) broadcast row
    logit = jnp.sum(hf * wf_row, axis=-1, keepdims=True)  # (tm, 1)
    logit = logit + bf_ref[0, 0]                        # scalar bias from SMEM
    # sigmoid; reciprocal on the EUP (approx) -- error ~1e-3, well inside tol.
    p = pl.reciprocal(1.0 + jnp.exp(-logit), approx=True)

    xf = x_bf.astype(jnp.float32)
    n = xf.shape[-1] // 2
    even = xf[:, :n]                                    # input[..., 0::2, :]
    odd = xf[:, n:]                                     # input[..., 1::2, :]
    # out = even*p + odd*(1-p)  ==  odd + p*(even - odd)   (one fewer VPU mul)
    o_ref[...] = (odd + p * (even - odd)).astype(o_ref.dtype)


def _round_up(x, mult):
    return ((x + mult - 1) // mult) * mult


def simple_merge_model(x6, W, B, wf, bf, *, tm=2048):
    """x6: (B, D1, D2, D3, S, n_dim) bf16. Returns (B, D1, D2, D3, S//2, n_dim)."""
    b0, d1, d2, d3, s, n = x6.shape
    assert s % 2 == 0
    two_n = 2 * n
    m = b0 * d1 * d2 * d3 * (s // 2)
    x2 = x6.reshape(m, two_n)                           # paired-token row view
    n_lin = W.shape[0]

    wf_row = wf.reshape(1, two_n)                       # (1, 2n) for VPU broadcast
    bf_s = bf.reshape(1, 1).astype(jnp.float32)         # scalar bias -> SMEM (32-bit)

    # Big row tiles keep the MXU busy and amortize per-grid-step overhead;
    # cap the tile at the (64-aligned) padded problem size so tiny inputs
    # don't burn a whole tile on zero padding.  Keep the tile height a
    # multiple of 16 (bf16 sublane packing / (8,128) rule).
    tm_eff = min(_round_up(max(tm, 16), 16), _round_up(m, 64))
    m_pad = _round_up(m, tm_eff)
    if m_pad != m:
        x2 = jnp.pad(x2, ((0, m_pad - m), (0, 0)))      # padded rows are discarded
    grid = (m_pad // tm_eff,)

    out2 = pl.pallas_call(
        functools.partial(_merge_kernel, n_lin=n_lin),
        out_shape=jax.ShapeDtypeStruct((m_pad, n), jnp.bfloat16),
        grid_spec=pltpu.PrefetchScalarGridSpec(
            num_scalar_prefetch=0,
            grid=grid,
            in_specs=[
                pl.BlockSpec((tm_eff, two_n), lambda i: (i, 0)),           # x rows
                pl.BlockSpec((n_lin, two_n, two_n), lambda i: (0, 0, 0)),  # stacked W (resident)
                pl.BlockSpec((n_lin, two_n), lambda i: (0, 0)),            # stacked bias
                pl.BlockSpec((1, two_n), lambda i: (0, 0)),                # final W row
                pl.BlockSpec(memory_space=pltpu.MemorySpace.SMEM),         # final bias scalar
            ],
            out_specs=pl.BlockSpec((tm_eff, n), lambda i: (i, 0)),
        ),
        compiler_params=pltpu.CompilerParams(
            dimension_semantics=("parallel",)),
    )(x2, W, B, wf_row, bf_s)

    return out2[:m].reshape(b0, d1, d2, d3, s // 2, n)


def _init_params(key, n_dim, n_layers):
    """Deterministic init matching nn.Linear default (uniform +/- 1/sqrt(fan_in))."""
    two_n = 2 * n_dim
    n_lin = 3 * n_layers
    bound = 1.0 / (two_n ** 0.5)
    k = jax.random.split(key, 2 * n_lin + 2)
    Ws, Bs = [], []
    for i in range(n_lin):
        # stored as (in, out) so kernel computes h @ W  (== torch x @ weight.T)
        Ws.append(jax.random.uniform(k[2 * i], (two_n, two_n), jnp.float32,
                                     -bound, bound))
        Bs.append(jax.random.uniform(k[2 * i + 1], (two_n,), jnp.float32,
                                     -bound, bound))
    W = jnp.stack(Ws).astype(jnp.bfloat16)              # (n_lin, 2n, 2n)
    B = jnp.stack(Bs).astype(jnp.bfloat16)              # (n_lin, 2n)
    wf = jax.random.uniform(k[-2], (two_n, 1), jnp.float32,
                            -bound, bound).astype(jnp.bfloat16)
    bf = jax.random.uniform(k[-1], (1, 1), jnp.float32,
                            -bound, bound).astype(jnp.bfloat16)
    return W, B, wf, bf


def _reference(x6, W, B, wf, bf):
    """Pure-JAX reference mirroring the kernel's bf16-operand / f32-accum math."""
    b0, d1, d2, d3, s, n = x6.shape
    m = b0 * d1 * d2 * d3 * (s // 2)
    h = x6.reshape(m, 2 * n)                            # bf16 rows
    for l in range(W.shape[0]):
        acc = jnp.dot(h, W[l], preferred_element_type=jnp.float32)
        acc = acc + B[l].astype(jnp.float32)
        acc = jnp.where(acc > 0, acc, jnp.exp(acc) - 1.0)
        h = acc.astype(jnp.bfloat16)
    logit = h.astype(jnp.float32) @ wf.astype(jnp.float32)
    logit = logit + bf.astype(jnp.float32)[0, 0]
    p = jax.nn.sigmoid(logit)                           # (m, 1)
    x = x6.astype(jnp.float32).reshape(m, 2 * n)
    even = x[:, :n]
    odd = x[:, n:]
    out = even * p + odd * (1.0 - p)
    return out.reshape(b0, d1, d2, d3, s // 2, n).astype(jnp.bfloat16)


if __name__ == "__main__":
    n_dim, n_layers = 32, 2
    key = jax.random.PRNGKey(0)
    kx, kp = jax.random.split(key)

    # input: (B, D1, D2, D3, S, n_dim) with S even
    x6 = jax.random.normal(kx, (2, 2, 2, 2, 8, n_dim), jnp.float32).astype(jnp.bfloat16)
    W, B, wf, bf = _init_params(kp, n_dim, n_layers)

    out = simple_merge_model(x6, W, B, wf, bf)
    out = jax.block_until_ready(out)
    ref = _reference(x6, W, B, wf, bf)
    assert out.shape == (2, 2, 2, 2, 4, n_dim)
    assert jnp.allclose(out.astype(jnp.float32), ref.astype(jnp.float32),
                        atol=3e-2, rtol=3e-2)

    # second check: m not a multiple of the tile -> exercises padding + multi-step grid
    x6b = jax.random.normal(jax.random.PRNGKey(1), (2, 2, 2, 2, 40, n_dim),
                            jnp.float32).astype(jnp.bfloat16)
    outb = jax.block_until_ready(simple_merge_model(x6b, W, B, wf, bf, tm=128))
    refb = _reference(x6b, W, B, wf, bf)
    assert outb.shape == (2, 2, 2, 2, 20, n_dim)
    assert jnp.allclose(outb.astype(jnp.float32), refb.astype(jnp.float32),
                        atol=3e-2, rtol=3e-2)

    print("KERNEL_OK")
</pallas_src>

<mosaic_0001>
module attributes {stable_mosaic.version = 11 : i64} {
  func.func @_merge_kernel(%arg0: i32, %arg1: memref<64x64xbf16, #tpu.memory_space<vmem>>, %arg2: memref<6x64x64xbf16, #tpu.memory_space<vmem>>, %arg3: memref<6x64xbf16, #tpu.memory_space<vmem>>, %arg4: memref<1x64xbf16, #tpu.memory_space<vmem>>, %arg5: memref<1x1xf32, #tpu.memory_space<smem>>, %arg6: memref<64x32xbf16, #tpu.memory_space<vmem>>) attributes {dimension_semantics = [#tpu.dimension_semantics<parallel>], iteration_bounds = array<i64: 1>, scalar_prefetch = 0 : i64, scratch_operands = 0 : i64, tpu.core_type = #tpu.core_type<tc>, window_params = [{transform_indices = @transform_0, window_bounds = array<i64: 64, 64>}, {pipeline_mode = #tpu.pipeline_mode<synchronous>, transform_indices = @transform_1, window_bounds = array<i64: 6, 64, 64>}, {pipeline_mode = #tpu.pipeline_mode<synchronous>, transform_indices = @transform_2, window_bounds = array<i64: 6, 64>}, {pipeline_mode = #tpu.pipeline_mode<synchronous>, transform_indices = @transform_3, window_bounds = array<i64: 1, 64>}, {transform_indices = @transform_4, window_bounds = array<i64: 1, 1>}, {transform_indices = @transform_5, window_bounds = array<i64: 64, 32>}]} {
    %c0 = arith.constant 0 : index
    %c0_0 = arith.constant 0 : index
    %0 = vector.load %arg1[%c0, %c0_0] : memref<64x64xbf16, #tpu.memory_space<vmem>>, vector<64x64xbf16>
    %c0_1 = arith.constant 0 : index
    %c0_2 = arith.constant 0 : index
    %c0_3 = arith.constant 0 : index
    %1 = vector.load %arg2[%c0_1, %c0_2, %c0_3] : memref<6x64x64xbf16, #tpu.memory_space<vmem>>, vector<1x64x64xbf16>
    %2 = vector.shape_cast %1 : vector<1x64x64xbf16> to vector<64x64xbf16>
    %cst = arith.constant dense<0.000000e+00> : vector<64x64xf32>
    %3 = tpu.matmul %0, %2, %cst {dimension_numbers = #tpu.dot_dimension_numbers<[1], [0], [0], [1], [0, 0, 1, 1], [], []>} : vector<64x64xbf16>, vector<64x64xbf16>, vector<64x64xf32> -> vector<64x64xf32>
    %c0_4 = arith.constant 0 : index
    %c0_5 = arith.constant 0 : index
    %4 = vector.load %arg3[%c0_4, %c0_5] : memref<6x64xbf16, #tpu.memory_space<vmem>>, vector<1x64xbf16>
    %5 = vector.shape_cast %4 : vector<1x64xbf16> to vector<64xbf16>
    %6 = arith.extf %5 : vector<64xbf16> to vector<64xf32>
    %7 = vector.shape_cast %6 : vector<64xf32> to vector<1x64xf32>
    %8 = vector.broadcast %7 : vector<1x64xf32> to vector<64x64xf32>
    %9 = arith.addf %3, %8 : vector<64x64xf32>
    %cst_6 = arith.constant 0.000000e+00 : f32
    %10 = vector.broadcast %cst_6 : f32 to vector<64x64xf32>
    %11 = arith.cmpf ogt, %9, %10 : vector<64x64xf32>
    %12 = math.exp %9 : vector<64x64xf32>
    %cst_7 = arith.constant 1.000000e+00 : f32
    %13 = vector.broadcast %cst_7 : f32 to vector<64x64xf32>
    %14 = arith.subf %12, %13 : vector<64x64xf32>
    %15 = arith.select %11, %9, %14 : vector<64x64xi1>, vector<64x64xf32>
    %16 = arith.truncf %15 : vector<64x64xf32> to vector<64x64xbf16>
    %c1 = arith.constant 1 : index
    %c0_8 = arith.constant 0 : index
    %c0_9 = arith.constant 0 : index
    %17 = vector.load %arg2[%c1, %c0_8, %c0_9] : memref<6x64x64xbf16, #tpu.memory_space<vmem>>, vector<1x64x64xbf16>
    %18 = vector.shape_cast %17 : vector<1x64x64xbf16> to vector<64x64xbf16>
    %cst_10 = arith.constant dense<0.000000e+00> : vector<64x64xf32>
    %19 = tpu.matmul %16, %18, %cst_10 {dimension_numbers = #tpu.dot_dimension_numbers<[1], [0], [0], [1], [0, 0, 1, 1], [], []>} : vector<64x64xbf16>, vector<64x64xbf16>, vector<64x64xf32> -> vector<64x64xf32>
    %c1_11 = arith.constant 1 : index
    %c0_12 = arith.constant 0 : index
    %20 = vector.load %arg3[%c1_11, %c0_12] : memref<6x64xbf16, #tpu.memory_space<vmem>>, vector<1x64xbf16>
    %21 = vector.shape_cast %20 : vector<1x64xbf16> to vector<64xbf16>
    %22 = arith.extf %21 : vector<64xbf16> to vector<64xf32>
    %23 = vector.shape_cast %22 : vector<64xf32> to vector<1x64xf32>
    %24 = vector.broadcast %23 : vector<1x64xf32> to vector<64x64xf32>
    %25 = arith.addf %19, %24 : vector<64x64xf32>
    %cst_13 = arith.constant 0.000000e+00 : f32
    %26 = vector.broadcast %cst_13 : f32 to vector<64x64xf32>
    %27 = arith.cmpf ogt, %25, %26 : vector<64x64xf32>
    %28 = math.exp %25 : vector<64x64xf32>
    %cst_14 = arith.constant 1.000000e+00 : f32
    %29 = vector.broadcast %cst_14 : f32 to vector<64x64xf32>
    %30 = arith.subf %28, %29 : vector<64x64xf32>
    %31 = arith.select %27, %25, %30 : vector<64x64xi1>, vector<64x64xf32>
    %32 = arith.truncf %31 : vector<64x64xf32> to vector<64x64xbf16>
    %c2 = arith.constant 2 : index
    %c0_15 = arith.constant 0 : index
    %c0_16 = arith.constant 0 : index
    %33 = vector.load %arg2[%c2, %c0_15, %c0_16] : memref<6x64x64xbf16, #tpu.memory_space<vmem>>, vector<1x64x64xbf16>
    %34 = vector.shape_cast %33 : vector<1x64x64xbf16> to vector<64x64xbf16>
    %cst_17 = arith.constant dense<0.000000e+00> : vector<64x64xf32>
    %35 = tpu.matmul %32, %34, %cst_17 {dimension_numbers = #tpu.dot_dimension_numbers<[1], [0], [0], [1], [0, 0, 1, 1], [], []>} : vector<64x64xbf16>, vector<64x64xbf16>, vector<64x64xf32> -> vector<64x64xf32>
    %c2_18 = arith.constant 2 : index
    %c0_19 = arith.constant 0 : index
    %36 = vector.load %arg3[%c2_18, %c0_19] : memref<6x64xbf16, #tpu.memory_space<vmem>>, vector<1x64xbf16>
    %37 = vector.shape_cast %36 : vector<1x64xbf16> to vector<64xbf16>
    %38 = arith.extf %37 : vector<64xbf16> to vector<64xf32>
    %39 = vector.shape_cast %38 : vector<64xf32> to vector<1x64xf32>
    %40 = vector.broadcast %39 : vector<1x64xf32> to vector<64x64xf32>
    %41 = arith.addf %35, %40 : vector<64x64xf32>
    %cst_20 = arith.constant 0.000000e+00 : f32
    %42 = vector.broadcast %cst_20 : f32 to vector<64x64xf32>
    %43 = arith.cmpf ogt, %41, %42 : vector<64x64xf32>
    %44 = math.exp %41 : vector<64x64xf32>
    %cst_21 = arith.constant 1.000000e+00 : f32
    %45 = vector.broadcast %cst_21 : f32 to vector<64x64xf32>
    %46 = arith.subf %44, %45 : vector<64x64xf32>
    %47 = arith.select %43, %41, %46 : vector<64x64xi1>, vector<64x64xf32>
    %48 = arith.truncf %47 : vector<64x64xf32> to vector<64x64xbf16>
    %c3 = arith.constant 3 : index
    %c0_22 = arith.constant 0 : index
    %c0_23 = arith.constant 0 : index
    %49 = vector.load %arg2[%c3, %c0_22, %c0_23] : memref<6x64x64xbf16, #tpu.memory_space<vmem>>, vector<1x64x64xbf16>
    %50 = vector.shape_cast %49 : vector<1x64x64xbf16> to vector<64x64xbf16>
    %cst_24 = arith.constant dense<0.000000e+00> : vector<64x64xf32>
    %51 = tpu.matmul %48, %50, %cst_24 {dimension_numbers = #tpu.dot_dimension_numbers<[1], [0], [0], [1], [0, 0, 1, 1], [], []>} : vector<64x64xbf16>, vector<64x64xbf16>, vector<64x64xf32> -> vector<64x64xf32>
    %c3_25 = arith.constant 3 : index
    %c0_26 = arith.constant 0 : index
    %52 = vector.load %arg3[%c3_25, %c0_26] : memref<6x64xbf16, #tpu.memory_space<vmem>>, vector<1x64xbf16>
    %53 = vector.shape_cast %52 : vector<1x64xbf16> to vector<64xbf16>
    %54 = arith.extf %53 : vector<64xbf16> to vector<64xf32>
    %55 = vector.shape_cast %54 : vector<64xf32> to vector<1x64xf32>
    %56 = vector.broadcast %55 : vector<1x64xf32> to vector<64x64xf32>
    %57 = arith.addf %51, %56 : vector<64x64xf32>
    %cst_27 = arith.constant 0.000000e+00 : f32
    %58 = vector.broadcast %cst_27 : f32 to vector<64x64xf32>
    %59 = arith.cmpf ogt, %57, %58 : vector<64x64xf32>
    %60 = math.exp %57 : vector<64x64xf32>
    %cst_28 = arith.constant 1.000000e+00 : f32
    %61 = vector.broadcast %cst_28 : f32 to vector<64x64xf32>
    %62 = arith.subf %60, %61 : vector<64x64xf32>
    %63 = arith.select %59, %57, %62 : vector<64x64xi1>, vector<64x64xf32>
    %64 = arith.truncf %63 : vector<64x64xf32> to vector<64x64xbf16>
    %c4 = arith.constant 4 : index
    %c0_29 = arith.constant 0 : index
    %c0_30 = arith.constant 0 : index
    %65 = vector.load %arg2[%c4, %c0_29, %c0_30] : memref<6x64x64xbf16, #tpu.memory_space<vmem>>, vector<1x64x64xbf16>
    %66 = vector.shape_cast %65 : vector<1x64x64xbf16> to vector<64x64xbf16>
    %cst_31 = arith.constant dense<0.000000e+00> : vector<64x64xf32>
    %67 = tpu.matmul %64, %66, %cst_31 {dimension_numbers = #tpu.dot_dimension_numbers<[1], [0], [0], [1], [0, 0, 1, 1], [], []>} : vector<64x64xbf16>, vector<64x64xbf16>, vector<64x64xf32> -> vector<64x64xf32>
    %c4_32 = arith.constant 4 : index
    %c0_33 = arith.constant 0 : index
    %68 = vector.load %arg3[%c4_32, %c0_33] : memref<6x64xbf16, #tpu.memory_space<vmem>>, vector<1x64xbf16>
    %69 = vector.shape_cast %68 : vector<1x64xbf16> to vector<64xbf16>
    %70 = arith.extf %69 : vector<64xbf16> to vector<64xf32>
    %71 = vector.shape_cast %70 : vector<64xf32> to vector<1x64xf32>
    %72 = vector.broadcast %71 : vector<1x64xf32> to vector<64x64xf32>
    %73 = arith.addf %67, %72 : vector<64x64xf32>
    %cst_34 = arith.constant 0.000000e+00 : f32
    %74 = vector.broadcast %cst_34 : f32 to vector<64x64xf32>
    %75 = arith.cmpf ogt, %73, %74 : vector<64x64xf32>
    %76 = math.exp %73 : vector<64x64xf32>
    %cst_35 = arith.constant 1.000000e+00 : f32
    %77 = vector.broadcast %cst_35 : f32 to vector<64x64xf32>
    %78 = arith.subf %76, %77 : vector<64x64xf32>
    %79 = arith.select %75, %73, %78 : vector<64x64xi1>, vector<64x64xf32>
    %80 = arith.truncf %79 : vector<64x64xf32> to vector<64x64xbf16>
    %c5 = arith.constant 5 : index
    %c0_36 = arith.constant 0 : index
    %c0_37 = arith.constant 0 : index
    %81 = vector.load %arg2[%c5, %c0_36, %c0_37] : memref<6x64x64xbf16, #tpu.memory_space<vmem>>, vector<1x64x64xbf16>
    %82 = vector.shape_cast %81 : vector<1x64x64xbf16> to vector<64x64xbf16>
    %cst_38 = arith.constant dense<0.000000e+00> : vector<64x64xf32>
    %83 = tpu.matmul %80, %82, %cst_38 {dimension_numbers = #tpu.dot_dimension_numbers<[1], [0], [0], [1], [0, 0, 1, 1], [], []>} : vector<64x64xbf16>, vector<64x64xbf16>, vector<64x64xf32> -> vector<64x64xf32>
    %c5_39 = arith.constant 5 : index
    %c0_40 = arith.constant 0 : index
    %84 = vector.load %arg3[%c5_39, %c0_40] : memref<6x64xbf16, #tpu.memory_space<vmem>>, vector<1x64xbf16>
    %85 = vector.shape_cast %84 : vector<1x64xbf16> to vector<64xbf16>
    %86 = arith.extf %85 : vector<64xbf16> to vector<64xf32>
    %87 = vector.shape_cast %86 : vector<64xf32> to vector<1x64xf32>
    %88 = vector.broadcast %87 : vector<1x64xf32> to vector<64x64xf32>
    %89 = arith.addf %83, %88 : vector<64x64xf32>
    %cst_41 = arith.constant 0.000000e+00 : f32
    %90 = vector.broadcast %cst_41 : f32 to vector<64x64xf32>
    %91 = arith.cmpf ogt, %89, %90 : vector<64x64xf32>
    %92 = math.exp %89 : vector<64x64xf32>
    %cst_42 = arith.constant 1.000000e+00 : f32
    %93 = vector.broadcast %cst_42 : f32 to vector<64x64xf32>
    %94 = arith.subf %92, %93 : vector<64x64xf32>
    %95 = arith.select %91, %89, %94 : vector<64x64xi1>, vector<64x64xf32>
    %96 = arith.truncf %95 : vector<64x64xf32> to vector<64x64xbf16>
    %97 = arith.extf %96 : vector<64x64xbf16> to vector<64x64xf32>
    %c0_43 = arith.constant 0 : index
    %c0_44 = arith.constant 0 : index
    %98 = vector.load %arg4[%c0_43, %c0_44] : memref<1x64xbf16, #tpu.memory_space<vmem>>, vector<1x64xbf16>
    %99 = arith.extf %98 : vector<1x64xbf16> to vector<1x64xf32>
    %100 = vector.broadcast %99 : vector<1x64xf32> to vector<64x64xf32>
    %101 = arith.mulf %97, %100 : vector<64x64xf32>
    %cst_45 = arith.constant dense<0.000000e+00> : vector<64xf32>
    %102 = vector.multi_reduction <add>, %101, %cst_45 [1] : vector<64x64xf32> to vector<64xf32>
    %103 = vector.shape_cast %102 : vector<64xf32> to vector<64x1xf32>
    %c0_46 = arith.constant 0 : index
    %c0_47 = arith.constant 0 : index
    %104 = memref.load %arg5[%c0_46, %c0_47] : memref<1x1xf32, #tpu.memory_space<smem>>
    %105 = vector.broadcast %104 : f32 to vector<64x1xf32>
    %106 = arith.addf %103, %105 : vector<64x1xf32>
    %cst_48 = arith.constant 0.000000e+00 : f32
    %107 = vector.broadcast %cst_48 : f32 to vector<64x1xf32>
    %108 = arith.subf %107, %106 : vector<64x1xf32>
    %109 = math.exp %108 : vector<64x1xf32>
    %cst_49 = arith.constant 1.000000e+00 : f32
    %110 = vector.broadcast %cst_49 : f32 to vector<64x1xf32>
    %111 = arith.addf %110, %109 : vector<64x1xf32>
    %112 = tpu.reciprocal %111 {approx = true} : vector<64x1xf32> -> vector<64x1xf32>
    %113 = arith.extf %0 : vector<64x64xbf16> to vector<64x64xf32>
    %114 = vector.extract_strided_slice %113 {offsets = [0, 0], sizes = [64, 32], strides = [1, 1]} : vector<64x64xf32> to vector<64x32xf32>
    %115 = vector.extract_strided_slice %113 {offsets = [0, 32], sizes = [64, 32], strides = [1, 1]} : vector<64x64xf32> to vector<64x32xf32>
    %116 = arith.subf %114, %115 : vector<64x32xf32>
    %117 = vector.broadcast %112 : vector<64x1xf32> to vector<64x32xf32>
    %118 = arith.mulf %117, %116 : vector<64x32xf32>
    %119 = arith.addf %115, %118 : vector<64x32xf32>
    %120 = arith.truncf %119 : vector<64x32xf32> to vector<64x32xbf16>
    %c0_50 = arith.constant 0 : index
    %c0_51 = arith.constant 0 : index
    %121 = vector.load %arg6[%c0_50, %c0_51] : memref<64x32xbf16, #tpu.memory_space<vmem>>, vector<64x32xbf16>
    tpu.vector_store %arg6[%c0_50, %c0_51], %120 {strides = array<i32>} : memref<64x32xbf16, #tpu.memory_space<vmem>>, vector<64x32xbf16>,
    return
  }
  func.func @transform_0(%arg0: i32) -> (i32, i32) {
    %c0_i32 = arith.constant 0 : i32
    %c0_i32_0 = arith.constant 0 : i32
    return %arg0, %c0_i32 : i32, i32
  }
  func.func @transform_1(%arg0: i32) -> (i32, i32, i32) {
    %c0_i32 = arith.constant 0 : i32
    %c0_i32_0 = arith.constant 0 : i32
    %c0_i32_1 = arith.constant 0 : i32
    %c0_i32_2 = arith.constant 0 : i32
    return %c0_i32, %c0_i32_0, %c0_i32_1 : i32, i32, i32
  }
  func.func @transform_2(%arg0: i32) -> (i32, i32) {
    %c0_i32 = arith.constant 0 : i32
    %c0_i32_0 = arith.constant 0 : i32
    %c0_i32_1 = arith.constant 0 : i32
    return %c0_i32, %c0_i32_0 : i32, i32
  }
  func.func @transform_3(%arg0: i32) -> (i32, i32) {
    %c0_i32 = arith.constant 0 : i32
    %c0_i32_0 = arith.constant 0 : i32
    %c0_i32_1 = arith.constant 0 : i32
    return %c0_i32, %c0_i32_0 : i32, i32
  }
  func.func @transform_4(%arg0: i32) -> (i32, i32) {
    %c0_i32 = arith.constant 0 : i32
    %c0_i32_0 = arith.constant 0 : i32
    %c0_i32_1 = arith.constant 0 : i32
    return %c0_i32, %c0_i32_0 : i32, i32
  }
  func.func @transform_5(%arg0: i32) -> (i32, i32) {
    %c0_i32 = arith.constant 0 : i32
    %c0_i32_0 = arith.constant 0 : i32
    return %arg0, %c0_i32 : i32, i32
  }
}

</mosaic_0001>

<bundles_post_ra>
// kernel: tpu_custom_call.1
= control target key start
LH: loop header
LB: loop body
LE: loop exit
PB: predicated region body
PF: predicated region fallthrough
CT: control target
= control target key end

     0   :  { %11 = vsyncpa [#allocation4], 0  ;;  %s2017_s0 = inlined_call_operand.hbm [shape: bf16[64,64], index: 0, kind: input, shape index: {}]   ;;  %s2018_s1 = inlined_call_operand.hbm [shape: bf16[6,64,64], index: 1, kind: input, shape index: {}]   ;;  %s2019_s2 = inlined_call_operand.vmem [shape: bf16[6,64], index: 2, kind: input, shape index: {}]   ;;  %s2020_s3 = inlined_call_operand.vmem [shape: bf16[1,64], index: 3, kind: input, shape index: {}]   ;;  %s2021_s4 = inlined_call_operand.<no memory space> [shape: f32[1,1], index: 4, kind: input, shape index: {}]   ;;  %s2022_s5 = inlined_call_operand.vmem [shape: bf16[64,32], index: 5, kind: output, shape index: {}]  }
   0x1   :  { %12 = vsyncpa [#allocation6], 0  ;;  %s1785_s18 = smov [#allocation3]   ;;  %s1737_s22 = scalar_lea.hbm %s2017_s0, 512 }
   0x2   :  { %s18_s19 = sshll.u32 %s1785_s18, 4  ;;  %p1738_p0 = scmp.ne.s32.totalorder %s2017_s0, %s1737_s22  ;;  %s19_s19 = int_to_ptr.vmem [resolvable:$true] %s18_s19 }
   0x3   :  { %p1741_p1 = scmp.lt.u32.totalorder %s1737_s22, %s2017_s0 }
   0x5   :  { %p1743_p2 = pnand %p1741_p1, %p1738_p0 }
   0x7   :  { %1746 = shalt.err (!%p1743_p2)
}
   0x8   :  { %s1747_s27 = scalar_lea.vmem %s19_s19, 512  ;;  %p1752_p4 = scmp.lt.s32.totalorder %s19_s19, %s19_s19 }
   0x9   :  { %p1748_p3 = scmp.ne.s32.totalorder %s19_s19, %s1747_s27  ;;  %p1753_p5 = scmp.lt.s32.totalorder %s1747_s27, %s1747_s27 }
   0xb   :  { %p1754_p6 = por %p1753_p5, %p1752_p4 }
   0xd   :  { %p1755_p7 = pnand %p1754_p6, %p1748_p3 }
   0xf   :  { %1758 = shalt.err (!%p1755_p7)
}
  0x10   :  { %s1786_s28 = smov 64   ;;  %s1787_s29 = smov 4  }
  0x11   :  { %24 = dma.hbm_to_vmem [thread:$0]  %s2017_s0, 512, %s19_s19, [#allocation4], %s1786_s28, %s1786_s28, %s1787_s29  }
  0x12   :  { %s1788_s7 = smov [#allocation5]   ;;  %s1759_s11 = scalar_lea.hbm %s2018_s1, 3072 }
  0x13   :  { %s30_s8 = sshll.u32 %s1788_s7, 4  ;;  %p1760_p8 = scmp.ne.s32.totalorder %s2018_s1, %s1759_s11  ;;  %s31_s8 = int_to_ptr.vmem [resolvable:$true] %s30_s8 }
  0x14   :  { %p1763_p9 = scmp.lt.u32.totalorder %s1759_s11, %s2018_s1 }
  0x16   :  { %p1765_p10 = pnand %p1763_p9, %p1760_p8 }
  0x18   :  { %1768 = shalt.err (!%p1765_p10)
}
  0x19   :  { %s1769_s16 = scalar_lea.vmem %s31_s8, 3072  ;;  %p1774_p12 = scmp.lt.s32.totalorder %s31_s8, %s31_s8 }
  0x1a   :  { %p1770_p11 = scmp.ne.s32.totalorder %s31_s8, %s1769_s16  ;;  %p1775_p13 = scmp.lt.s32.totalorder %s1769_s16, %s1769_s16 }
  0x1c   :  { %p1776_p0 = por %p1775_p13, %p1774_p12 }
  0x1e   :  { %p1777_p1 = pnand %p1776_p0, %p1770_p11 }
  0x20   :  { %1780 = shalt.err (!%p1777_p1)
}
  0x21   :  { %36 = dma.hbm_to_vmem [thread:$0]  %s2018_s1, 3072, %s31_s8, [#allocation6], %s1786_s28, %s1786_s28, %s1787_s29  }
  0x22   :  { %1781 = dma.done.wait [#allocation4], 512  }
  0x23   :  { %1782 = vsyncadd [#allocation4], 4294966784 }
  0x24   :  { %1783 = dma.done.wait [#allocation6], 3072  }
  0x25   :  { %1784 = vsyncadd [#allocation6], 4294964224  ;;  %v1573_v0 = vld [vmem:[#allocation5] sm:$0xff]   ;;  %v1574_v1 = vld [vmem:[#allocation5 + $0x8] sm:$0xff]   ;;  %vm116_vm0 = vcmask 523264   ;;  %v68_v12 = vlaneseq }
  0x26   :  { %1451 = vmatprep.subr.bf16.mxu0 %v1573_v0  ;;  %v1575_v2 = vld [vmem:[#allocation5 + $0x10] sm:$0xff]   ;;  %v50_v3 = vld [vmem:[#allocation3] sm:$0xff]   ;;  %v1576_v4 = vld [vmem:[#allocation5 + $0x18] sm:$0xff]  }
  0x27   :  { %1452 = vmatpush3.bf16.msra.mxu0 %v1573_v0  ;;  %1459 = vmatprep.mubr.msk.bf16.mxu0 %vm116_vm0, %v50_v3  ;;  %v52_v5 = vld [vmem:[#allocation3 + $0x8] sm:$0xff]   ;;  %v54_v6 = vld [vmem:[#allocation3 + $0x10] sm:$0xff]   ;;  %v56_v7 = vld [vmem:[#allocation3 + $0x18] sm:$0xff]   ;;  %v1849_v13 = vshrl.u32 %v68_v12, 7 }
  0x28   :  { %1453 = vmatprep.subr.bf16.mxu0 %v1574_v1  ;;  %v1581_v8 = vld [vmem:[#allocation5 + $0x20] sm:$0xff]   ;;  %v1582_v9 = vld [vmem:[#allocation5 + $0x28] sm:$0xff]   ;;  %v1583_v10 = vld [vmem:[#allocation5 + $0x30] sm:$0xff]  }
  0x29   :  { %1467 = vmatprep.subr.bf16.mxu1 %v1581_v8  ;;  %v1584_v11 = vld [vmem:[#allocation5 + $0x38] sm:$0xff]   ;;  %v1854_v14 = vld [vmem:[%s2019_s2] sm:$0x1]  ;;  %v70_v16 = vsub.s32 0, %v1849_v13 }
  0x2a   :  { %1468 = vmatpush3.bf16.msra.mxu1 %v1581_v8  ;;  %v67_v15 = vunpack.c.l.bf16 %v1854_v14  ;;  %v1587_v8 = vld [vmem:[#allocation5 + $0x50] sm:$0xff]  }
  0x2b   :  { %1454 = vmatpush3.bf16.msra.mxu0 %v1574_v1  ;;  %1469 = vmatprep.subr.bf16.mxu1 %v1582_v9 }
  0x2c   :  { %1455 = vmatprep.subr.bf16.mxu0 %v1575_v2  ;;  %v71_v17 = vrot.slane %v67_v15, %v70_v16 }
  0x2e   :  { %1470 = vmatpush3.bf16.msra.mxu1 %v1582_v9  ;;  %v1588_v9 = vld [vmem:[#allocation5 + $0x58] sm:$0xff]  }
  0x2f   :  { %1456 = vmatpush3.bf16.msra.mxu0 %v1575_v2  ;;  %1471 = vmatprep.subr.bf16.mxu1 %v1583_v10 }
  0x30   :  { %1457 = vmatprep.subr.bf16.mxu0 %v1576_v4 }
  0x32   :  { %1472 = vmatpush3.bf16.msra.mxu1 %v1583_v10  ;;  %v249_v10 = vsub.s32 1, %v1849_v13 }
  0x33   :  { %1458 = vmatpush3.bf16.msra.mxu0 %v1576_v4  ;;  %1473 = vmatprep.subr.bf16.mxu1 %v1584_v11 }
  0x36   :  { %1460 = vmatmul.mubr.msk.bf16.vlgmr.msra.gmra.mrb[0].mxu0 %vm116_vm0, %v52_v5  ;;  %1474 = vmatpush3.bf16.msra.mxu1 %v1584_v11  ;;  %v250_v11 = vrot.slane %v67_v15, %v249_v10 }
  0x37   :  { %1463 = vmatprep.mubr.msk.bf16.mxu0 %vm116_vm0, %v54_v6  ;;  %v1585_v6 = vld [vmem:[#allocation5 + $0x40] sm:$0xff]  }
  0x38   :  { %1483 = vmatprep.subr.bf16.mxu0 %v1585_v6 }
  0x39   :  { %1484 = vmatpush3.bf16.msra.mxu0 %v1585_v6  ;;  %v1876_v6 = vld [vmem:[%s2019_s2] sm:$0x2] }
  0x3e   :  { %1464 = vmatmul.mubr.msk.bf16.gmra.mrb[4].mxu0 %vm116_vm0, %v56_v7  ;;  %v1586_v7 = vld [vmem:[#allocation5 + $0x48] sm:$0xff]  }
  0x3f   :  { %1485 = vmatprep.subr.bf16.mxu0 %v1586_v7 }
  0x40   :  { %1486 = vmatpush3.bf16.msra.mxu0 %v1586_v7  ;;  %v406_v7 = vunpack.c.l.bf16 %v1876_v6 }
  0x41   :  { %1487 = vmatprep.subr.bf16.mxu0 %v1587_v8 }
  0x44   :  { %1488 = vmatpush3.bf16.msra.mxu0 %v1587_v8  ;;  %v409_v8 = vsub.s32 2, %v1849_v13 }
  0x45   :  { %1489 = vmatprep.subr.bf16.mxu0 %v1588_v9 }
  0x48   :  { %1490 = vmatpush3.bf16.msra.mxu0 %v1588_v9  ;;  %v410_v9 = vrot.slane %v406_v7, %v409_v8 }
 0x109   :  { %v1461_v18 = vpop.f32.mrb[0].mxu0 }
 0x10a   :  { %v172_v19 = vadd.f32 %v1461_v18, %v71_v17  ;;  %v163_v20 = vpop.f32.mrb[1].mxu0 }
 0x10b   :  { %v164_v21 = vadd.f32 %v163_v20, %v71_v17  ;;  %v1462_v22 = vpop.f32.mrb[2].mxu0 }
 0x10c   :  { %v206_v23 = vmul.f32 1.442695, %v172_v19  ;;  %v175_v24 = vadd.f32 %v1462_v22, %v71_v17  ;;  %v166_v25 = vpop.f32.mrb[3].mxu0  ;;  %vm196_vm1 = vcmp.gt.f32.partialorder %v172_v19, 0.0 }
 0x10d   :  { %v202_v26 = vmul.f32 1.442695, %v164_v21  ;;  %v167_v27 = vadd.f32 %v166_v25, %v71_v17  ;;  %vm194_vm3 = vcmp.gt.f32.partialorder %v164_v21, 0.0 }
 0x10e   :  { %1605 = vpow2.f32 %v206_v23  ;;  %v208_v28 = vmul.f32 1.442695, %v175_v24  ;;  %vm197_vm2 = vcmp.gt.f32.partialorder %v175_v24, 0.0 }
 0x10f   :  { %1607 = vpow2.f32 %v202_v26  ;;  %v204_v29 = vmul.f32 1.442695, %v167_v27  ;;  %vm195_vm4 = vcmp.gt.f32.partialorder %v167_v27, 0.0 }
 0x110   :  { %1609 = vpow2.f32 %v208_v28 }
 0x111   :  { %1611 = vpow2.f32 %v204_v29  ;;  %v1465_v30 = vpop.f32.mrb[4].mxu0 }
 0x112   :  { %v188_v31 = vadd.f32 %v1465_v30, %v71_v17  ;;  %v179_v32 = vpop.f32.mrb[5].mxu0 }
 0x113   :  { %v180_v33 = vadd.f32 %v179_v32, %v71_v17  ;;  %v1466_v34 = vpop.f32.mrb[6].mxu0 }
 0x114   :  { %v214_v35 = vmul.f32 1.442695, %v188_v31  ;;  %v191_v36 = vadd.f32 %v1466_v34, %v71_v17  ;;  %v182_v37 = vpop.f32.mrb[7].mxu0  ;;  %vm200_vm5 = vcmp.gt.f32.partialorder %v188_v31, 0.0 }
 0x115   :  { %v210_v38 = vmul.f32 1.442695, %v180_v33  ;;  %v183_v39 = vadd.f32 %v182_v37, %v71_v17  ;;  %vm198_vm7 = vcmp.gt.f32.partialorder %v180_v33, 0.0 }
 0x116   :  { %1613 = vpow2.f32 %v214_v35  ;;  %v216_v40 = vmul.f32 1.442695, %v191_v36  ;;  %vm201_vm6 = vcmp.gt.f32.partialorder %v191_v36, 0.0 }
 0x117   :  { %1615 = vpow2.f32 %v210_v38  ;;  %v212_v41 = vmul.f32 1.442695, %v183_v39  ;;  %vm199_vm8 = vcmp.gt.f32.partialorder %v183_v39, 0.0 }
 0x118   :  { %v1606_v42 = vpop.eup %1605  ;;  %1617 = vpow2.f32 %v216_v40 }
 0x119   :  { %v1608_v43 = vpop.eup %1607  ;;  %v1301_v44 = vadd.f32 -1.0, %v1606_v42  ;;  %1619 = vpow2.f32 %v212_v41 }
 0x11a   :  { %v1610_v45 = vpop.eup %1609  ;;  %v1299_v46 = vadd.f32 -1.0, %v1608_v43 }
 0x11b   :  { %v1612_v47 = vpop.eup %1611  ;;  %v1302_v48 = vadd.f32 -1.0, %v1610_v45  ;;  %v228_v50 = vsel %vm196_vm1, %v172_v19, %v1301_v44 }
 0x11c   :  { %v1300_v49 = vadd.f32 -1.0, %v1612_v47  ;;  %v226_v53 = vsel %vm194_vm3, %v164_v21, %v1299_v46 }
 0x11d   :  { %v229_v51 = vsel %vm197_vm2, %v175_v24, %v1302_v48 }
 0x11e   :  { %v235_v52 = vpack.c.bf16 %v229_v51, %v228_v50  ;;  %v227_v54 = vsel %vm195_vm4, %v167_v27, %v1300_v49 }
 0x11f   :  { %v234_v55 = vpack.c.bf16 %v227_v54, %v226_v53 }
 0x120   :  { %v1614_v56 = vpop.eup %1613 }
 0x121   :  { %v1616_v57 = vpop.eup %1615  ;;  %v1305_v58 = vadd.f32 -1.0, %v1614_v56  ;;  %1475 = vmatprep.mubr.msk.bf16.mxu1 %vm116_vm0, %v234_v55 }
 0x122   :  { %v1618_v59 = vpop.eup %1617  ;;  %v1303_v60 = vadd.f32 -1.0, %v1616_v57  ;;  %1476 = vmatmul.mubr.msk.bf16.vlgmr.msra.gmra.mrb[0].mxu1 %vm116_vm0, %v235_v52 }
 0x123   :  { %v1620_v61 = vpop.eup %1619  ;;  %v1306_v62 = vadd.f32 -1.0, %v1618_v59  ;;  %v232_v0 = vsel %vm200_vm5, %v188_v31, %v1305_v58 }
 0x124   :  { %v1304_v63 = vadd.f32 -1.0, %v1620_v61  ;;  %v230_v2 = vsel %vm198_vm7, %v180_v33, %v1303_v60 }
 0x125   :  { %v233_v1 = vsel %vm201_vm6, %v191_v36, %v1306_v62 }
 0x126   :  { %v237_v3 = vpack.c.bf16 %v233_v1, %v232_v0  ;;  %v231_v4 = vsel %vm199_vm8, %v183_v39, %v1304_v63 }
 0x127   :  { %v236_v5 = vpack.c.bf16 %v231_v4, %v230_v2  ;;  %v1589_v2 = vld [vmem:[#allocation5 + $0x60] sm:$0xff]   ;;  %v1591_v4 = vld [vmem:[#allocation5 + $0x70] sm:$0xff]  }
 0x128   :  { %1499 = vmatprep.subr.bf16.mxu1 %v1589_v2 }
 0x129   :  { %1479 = vmatprep.mubr.msk.bf16.mxu1 %vm116_vm0, %v236_v5  ;;  %1500 = vmatpush3.bf16.msra.mxu1 %v1589_v2  ;;  %v1592_v5 = vld [vmem:[#allocation5 + $0x78] sm:$0xff]   ;;  %v1595_v2 = vld [vmem:[#allocation5 + $0x90] sm:$0xff]  }
 0x12a   :  { %1480 = vmatmul.mubr.msk.bf16.gmra.mrb[4].mxu1 %vm116_vm0, %v237_v3  ;;  %v1590_v3 = vld [vmem:[#allocation5 + $0x68] sm:$0xff]  }
 0x12b   :  { %1501 = vmatprep.subr.bf16.mxu1 %v1590_v3 }
 0x12d   :  { %1502 = vmatpush3.bf16.msra.mxu1 %v1590_v3  ;;  %v1596_v3 = vld [vmem:[#allocation5 + $0x98] sm:$0xff]  }
 0x12e   :  { %1503 = vmatprep.subr.bf16.mxu1 %v1591_v4 }
 0x131   :  { %1504 = vmatpush3.bf16.msra.mxu1 %v1591_v4  ;;  %v567_v4 = vsub.s32 3, %v1849_v13 }
 0x132   :  { %1505 = vmatprep.subr.bf16.mxu1 %v1592_v5 }
 0x135   :  { %1506 = vmatpush3.bf16.msra.mxu1 %v1592_v5  ;;  %v568_v5 = vrot.slane %v406_v7, %v567_v4 }
 0x1f5   :  { %v1477_v12 = vpop.f32.mrb[0].mxu1 }
 0x1f6   :  { %v330_v17 = vadd.f32 %v1477_v12, %v250_v11  ;;  %v321_v18 = vpop.f32.mrb[1].mxu1 }
 0x1f7   :  { %v322_v19 = vadd.f32 %v321_v18, %v250_v11  ;;  %v1478_v20 = vpop.f32.mrb[2].mxu1 }
 0x1f8   :  { %v364_v21 = vmul.f32 1.442695, %v330_v17  ;;  %v333_v22 = vadd.f32 %v1478_v20, %v250_v11  ;;  %v324_v23 = vpop.f32.mrb[3].mxu1  ;;  %vm354_vm9 = vcmp.gt.f32.partialorder %v330_v17, 0.0 }
 0x1f9   :  { %v360_v24 = vmul.f32 1.442695, %v322_v19  ;;  %v325_v25 = vadd.f32 %v324_v23, %v250_v11  ;;  %vm352_vm11 = vcmp.gt.f32.partialorder %v322_v19, 0.0 }
 0x1fa   :  { %1621 = vpow2.f32 %v364_v21  ;;  %v366_v26 = vmul.f32 1.442695, %v333_v22  ;;  %vm355_vm10 = vcmp.gt.f32.partialorder %v333_v22, 0.0 }
 0x1fb   :  { %1623 = vpow2.f32 %v360_v24  ;;  %v362_v27 = vmul.f32 1.442695, %v325_v25  ;;  %vm353_vm12 = vcmp.gt.f32.partialorder %v325_v25, 0.0 }
 0x1fc   :  { %1625 = vpow2.f32 %v366_v26 }
 0x1fd   :  { %1627 = vpow2.f32 %v362_v27  ;;  %v1481_v28 = vpop.f32.mrb[4].mxu1 }
 0x1fe   :  { %v346_v29 = vadd.f32 %v1481_v28, %v250_v11  ;;  %v337_v14 = vpop.f32.mrb[5].mxu1 }
 0x1ff   :  { %v338_v15 = vadd.f32 %v337_v14, %v250_v11  ;;  %v1482_v30 = vpop.f32.mrb[6].mxu1 }
 0x200   :  { %v372_v31 = vmul.f32 1.442695, %v346_v29  ;;  %v349_v32 = vadd.f32 %v1482_v30, %v250_v11  ;;  %v340_v33 = vpop.f32.mrb[7].mxu1  ;;  %vm358_vm13 = vcmp.gt.f32.partialorder %v346_v29, 0.0 }
 0x201   :  { %v368_v34 = vmul.f32 1.442695, %v338_v15  ;;  %v341_v35 = vadd.f32 %v340_v33, %v250_v11  ;;  %vm356_vm15 = vcmp.gt.f32.partialorder %v338_v15, 0.0 }
 0x202   :  { %1629 = vpow2.f32 %v372_v31  ;;  %v374_v36 = vmul.f32 1.442695, %v349_v32  ;;  %vm359_vm14 = vcmp.gt.f32.partialorder %v349_v32, 0.0 }
 0x203   :  { %1631 = vpow2.f32 %v368_v34  ;;  %v370_v37 = vmul.f32 1.442695, %v341_v35  ;;  %vm357_vm1 = vcmp.gt.f32.partialorder %v341_v35, 0.0 }
 0x204   :  { %v1622_v38 = vpop.eup %1621  ;;  %1633 = vpow2.f32 %v374_v36 }
 0x205   :  { %v1624_v39 = vpop.eup %1623  ;;  %v1317_v40 = vadd.f32 -1.0, %v1622_v38  ;;  %1635 = vpow2.f32 %v370_v37 }
 0x206   :  { %v1626_v41 = vpop.eup %1625  ;;  %v1315_v42 = vadd.f32 -1.0, %v1624_v39 }
 0x207   :  { %v1628_v43 = vpop.eup %1627  ;;  %v1318_v44 = vadd.f32 -1.0, %v1626_v41  ;;  %v386_v46 = vsel %vm354_vm9, %v330_v17, %v1317_v40 }
 0x208   :  { %v1316_v45 = vadd.f32 -1.0, %v1628_v43  ;;  %v384_v48 = vsel %vm352_vm11, %v322_v19, %v1315_v42 }
 0x209   :  { %v387_v47 = vsel %vm355_vm10, %v333_v22, %v1318_v44 }
 0x20a   :  { %v393_v49 = vpack.c.bf16 %v387_v47, %v386_v46  ;;  %v385_v50 = vsel %vm353_vm12, %v325_v25, %v1316_v45 }
 0x20b   :  { %v392_v51 = vpack.c.bf16 %v385_v50, %v384_v48 }
 0x20c   :  { %v1630_v52 = vpop.eup %1629 }
 0x20d   :  { %v1632_v53 = vpop.eup %1631  ;;  %v1321_v54 = vadd.f32 -1.0, %v1630_v52  ;;  %1491 = vmatprep.mubr.msk.bf16.mxu0 %vm116_vm0, %v392_v51 }
 0x20e   :  { %v1634_v55 = vpop.eup %1633  ;;  %v1319_v56 = vadd.f32 -1.0, %v1632_v53  ;;  %1492 = vmatmul.mubr.msk.bf16.vlgmr.msra.gmra.mrb[8].mxu0 %vm116_vm0, %v393_v49 }
 0x20f   :  { %v1636_v57 = vpop.eup %1635  ;;  %v1322_v58 = vadd.f32 -1.0, %v1634_v55  ;;  %v390_v60 = vsel %vm358_vm13, %v346_v29, %v1321_v54 }
 0x210   :  { %v1320_v59 = vadd.f32 -1.0, %v1636_v57  ;;  %v388_v62 = vsel %vm356_vm15, %v338_v15, %v1319_v56 }
 0x211   :  { %v391_v61 = vsel %vm359_vm14, %v349_v32, %v1322_v58 }
 0x212   :  { %v395_v63 = vpack.c.bf16 %v391_v61, %v390_v60  ;;  %v389_v0 = vsel %vm357_vm1, %v341_v35, %v1320_v59 }
 0x213   :  { %v394_v1 = vpack.c.bf16 %v389_v0, %v388_v62  ;;  %v1593_v0 = vld [vmem:[#allocation5 + $0x80] sm:$0xff]  }
 0x214   :  { %1515 = vmatprep.subr.bf16.mxu0 %v1593_v0 }
 0x215   :  { %1495 = vmatprep.mubr.msk.bf16.mxu0 %vm116_vm0, %v394_v1  ;;  %1516 = vmatpush3.bf16.msra.mxu0 %v1593_v0  ;;  %v1594_v1 = vld [vmem:[#allocation5 + $0x88] sm:$0xff]   ;;  %v1896_v0 = vld [vmem:[%s2019_s2] sm:$0x4] }
 0x216   :  { %1496 = vmatmul.mubr.msk.bf16.gmra.mrb[12].mxu0 %vm116_vm0, %v395_v63  ;;  %1517 = vmatprep.subr.bf16.mxu0 %v1594_v1 }
 0x219   :  { %1518 = vmatpush3.bf16.msra.mxu0 %v1594_v1  ;;  %v724_v1 = vunpack.c.l.bf16 %v1896_v0 }
 0x21a   :  { %1519 = vmatprep.subr.bf16.mxu0 %v1595_v2 }
 0x21d   :  { %1520 = vmatpush3.bf16.msra.mxu0 %v1595_v2  ;;  %v727_v2 = vsub.s32 4, %v1849_v13 }
 0x21e   :  { %1521 = vmatprep.subr.bf16.mxu0 %v1596_v3 }
 0x221   :  { %1522 = vmatpush3.bf16.msra.mxu0 %v1596_v3  ;;  %v728_v3 = vrot.slane %v724_v1, %v727_v2 }
 0x2e1   :  { %v1493_v10 = vpop.f32.mrb[8].mxu0 }
 0x2e2   :  { %v490_v11 = vadd.f32 %v1493_v10, %v410_v9  ;;  %v481_v12 = vpop.f32.mrb[9].mxu0 }
 0x2e3   :  { %v482_v17 = vadd.f32 %v481_v12, %v410_v9  ;;  %v1494_v18 = vpop.f32.mrb[10].mxu0 }
 0x2e4   :  { %v524_v19 = vmul.f32 1.442695, %v490_v11  ;;  %v493_v20 = vadd.f32 %v1494_v18, %v410_v9  ;;  %v484_v21 = vpop.f32.mrb[11].mxu0  ;;  %vm514_vm2 = vcmp.gt.f32.partialorder %v490_v11, 0.0 }
 0x2e5   :  { %v520_v22 = vmul.f32 1.442695, %v482_v17  ;;  %v485_v23 = vadd.f32 %v484_v21, %v410_v9  ;;  %vm512_vm4 = vcmp.gt.f32.partialorder %v482_v17, 0.0 }
 0x2e6   :  { %1637 = vpow2.f32 %v524_v19  ;;  %v526_v24 = vmul.f32 1.442695, %v493_v20  ;;  %vm515_vm3 = vcmp.gt.f32.partialorder %v493_v20, 0.0 }
 0x2e7   :  { %1639 = vpow2.f32 %v520_v22  ;;  %v522_v25 = vmul.f32 1.442695, %v485_v23  ;;  %vm513_vm5 = vcmp.gt.f32.partialorder %v485_v23, 0.0 }
 0x2e8   :  { %1641 = vpow2.f32 %v526_v24 }
 0x2e9   :  { %1643 = vpow2.f32 %v522_v25  ;;  %v1497_v26 = vpop.f32.mrb[12].mxu0 }
 0x2ea   :  { %v506_v27 = vadd.f32 %v1497_v26, %v410_v9  ;;  %v497_v28 = vpop.f32.mrb[13].mxu0 }
 0x2eb   :  { %v498_v29 = vadd.f32 %v497_v28, %v410_v9  ;;  %v1498_v14 = vpop.f32.mrb[14].mxu0 }
 0x2ec   :  { %v532_v15 = vmul.f32 1.442695, %v506_v27  ;;  %v509_v30 = vadd.f32 %v1498_v14, %v410_v9  ;;  %v500_v31 = vpop.f32.mrb[15].mxu0  ;;  %vm518_vm6 = vcmp.gt.f32.partialorder %v506_v27, 0.0 }
 0x2ed   :  { %v528_v32 = vmul.f32 1.442695, %v498_v29  ;;  %v501_v33 = vadd.f32 %v500_v31, %v410_v9  ;;  %vm516_vm8 = vcmp.gt.f32.partialorder %v498_v29, 0.0 }
 0x2ee   :  { %1645 = vpow2.f32 %v532_v15  ;;  %v534_v34 = vmul.f32 1.442695, %v509_v30  ;;  %vm519_vm7 = vcmp.gt.f32.partialorder %v509_v30, 0.0 }
 0x2ef   :  { %1647 = vpow2.f32 %v528_v32  ;;  %v530_v35 = vmul.f32 1.442695, %v501_v33  ;;  %vm517_vm9 = vcmp.gt.f32.partialorder %v501_v33, 0.0 }
 0x2f0   :  { %v1638_v36 = vpop.eup %1637  ;;  %1649 = vpow2.f32 %v534_v34 }
 0x2f1   :  { %v1640_v37 = vpop.eup %1639  ;;  %v1333_v38 = vadd.f32 -1.0, %v1638_v36  ;;  %1651 = vpow2.f32 %v530_v35 }
 0x2f2   :  { %v1642_v39 = vpop.eup %1641  ;;  %v1331_v40 = vadd.f32 -1.0, %v1640_v37 }
 0x2f3   :  { %v1644_v41 = vpop.eup %1643  ;;  %v1334_v42 = vadd.f32 -1.0, %v1642_v39  ;;  %v546_v44 = vsel %vm514_vm2, %v490_v11, %v1333_v38 }
 0x2f4   :  { %v1332_v43 = vadd.f32 -1.0, %v1644_v41  ;;  %v544_v46 = vsel %vm512_vm4, %v482_v17, %v1331_v40 }
 0x2f5   :  { %v547_v45 = vsel %vm515_vm3, %v493_v20, %v1334_v42 }
 0x2f6   :  { %v553_v47 = vpack.c.bf16 %v547_v45, %v546_v44  ;;  %v545_v48 = vsel %vm513_vm5, %v485_v23, %v1332_v43 }
 0x2f7   :  { %v552_v49 = vpack.c.bf16 %v545_v48, %v544_v46 }
 0x2f8   :  { %v1646_v50 = vpop.eup %1645 }
 0x2f9   :  { %v1648_v51 = vpop.eup %1647  ;;  %v1337_v52 = vadd.f32 -1.0, %v1646_v50  ;;  %1507 = vmatprep.mubr.msk.bf16.mxu1 %vm116_vm0, %v552_v49 }
 0x2fa   :  { %v1650_v53 = vpop.eup %1649  ;;  %v1335_v54 = vadd.f32 -1.0, %v1648_v51  ;;  %1508 = vmatmul.mubr.msk.bf16.vlgmr.msra.gmra.mrb[8].mxu1 %vm116_vm0, %v553_v47 }
 0x2fb   :  { %v1652_v55 = vpop.eup %1651  ;;  %v1338_v56 = vadd.f32 -1.0, %v1650_v53  ;;  %v550_v58 = vsel %vm518_vm6, %v506_v27, %v1337_v52 }
 0x2fc   :  { %v1336_v57 = vadd.f32 -1.0, %v1652_v55  ;;  %v548_v60 = vsel %vm516_vm8, %v498_v29, %v1335_v54 }
 0x2fd   :  { %v551_v59 = vsel %vm519_vm7, %v509_v30, %v1338_v56 }
 0x2fe   :  { %v555_v61 = vpack.c.bf16 %v551_v59, %v550_v58  ;;  %v549_v62 = vsel %vm517_vm9, %v501_v33, %v1336_v57 }
 0x2ff   :  { %v554_v63 = vpack.c.bf16 %v549_v62, %v548_v60  ;;  %v1597_v60 = vld [vmem:[#allocation5 + $0xa0] sm:$0xff]   ;;  %v1599_v62 = vld [vmem:[#allocation5 + $0xb0] sm:$0xff]  }
 0x300   :  { %1531 = vmatprep.subr.bf16.mxu1 %v1597_v60 }
 0x301   :  { %1511 = vmatprep.mubr.msk.bf16.mxu1 %vm116_vm0, %v554_v63  ;;  %1532 = vmatpush3.bf16.msra.mxu1 %v1597_v60  ;;  %v1600_v63 = vld [vmem:[#allocation5 + $0xb8] sm:$0xff]  }
 0x302   :  { %1512 = vmatmul.mubr.msk.bf16.gmra.mrb[12].mxu1 %vm116_vm0, %v555_v61  ;;  %v1598_v61 = vld [vmem:[#allocation5 + $0xa8] sm:$0xff]  }
 0x303   :  { %1533 = vmatprep.subr.bf16.mxu1 %v1598_v61 }
 0x305   :  { %1534 = vmatpush3.bf16.msra.mxu1 %v1598_v61 }
 0x306   :  { %1535 = vmatprep.subr.bf16.mxu1 %v1599_v62 }
 0x309   :  { %1536 = vmatpush3.bf16.msra.mxu1 %v1599_v62 }
 0x30a   :  { %1537 = vmatprep.subr.bf16.mxu1 %v1600_v63 }
 0x30d   :  { %1538 = vmatpush3.bf16.msra.mxu1 %v1600_v63 }
 0x3cd   :  { %v1509_v8 = vpop.f32.mrb[8].mxu1 }
 0x3ce   :  { %v648_v9 = vadd.f32 %v1509_v8, %v568_v5  ;;  %v639_v10 = vpop.f32.mrb[9].mxu1 }
 0x3cf   :  { %v640_v11 = vadd.f32 %v639_v10, %v568_v5  ;;  %v1510_v12 = vpop.f32.mrb[10].mxu1 }
 0x3d0   :  { %v682_v17 = vmul.f32 1.442695, %v648_v9  ;;  %v651_v18 = vadd.f32 %v1510_v12, %v568_v5  ;;  %v642_v19 = vpop.f32.mrb[11].mxu1  ;;  %vm672_vm10 = vcmp.gt.f32.partialorder %v648_v9, 0.0 }
 0x3d1   :  { %v678_v20 = vmul.f32 1.442695, %v640_v11  ;;  %v643_v21 = vadd.f32 %v642_v19, %v568_v5  ;;  %vm670_vm12 = vcmp.gt.f32.partialorder %v640_v11, 0.0 }
 0x3d2   :  { %1653 = vpow2.f32 %v682_v17  ;;  %v684_v22 = vmul.f32 1.442695, %v651_v18  ;;  %vm673_vm11 = vcmp.gt.f32.partialorder %v651_v18, 0.0 }
 0x3d3   :  { %1655 = vpow2.f32 %v678_v20  ;;  %v680_v23 = vmul.f32 1.442695, %v643_v21  ;;  %vm671_vm13 = vcmp.gt.f32.partialorder %v643_v21, 0.0 }
 0x3d4   :  { %1657 = vpow2.f32 %v684_v22 }
 0x3d5   :  { %1659 = vpow2.f32 %v680_v23  ;;  %v1513_v24 = vpop.f32.mrb[12].mxu1 }
 0x3d6   :  { %v664_v25 = vadd.f32 %v1513_v24, %v568_v5  ;;  %v655_v6 = vpop.f32.mrb[13].mxu1 }
 0x3d7   :  { %v656_v7 = vadd.f32 %v655_v6, %v568_v5  ;;  %v1514_v26 = vpop.f32.mrb[14].mxu1 }
 0x3d8   :  { %v690_v27 = vmul.f32 1.442695, %v664_v25  ;;  %v667_v28 = vadd.f32 %v1514_v26, %v568_v5  ;;  %v658_v29 = vpop.f32.mrb[15].mxu1  ;;  %vm676_vm14 = vcmp.gt.f32.partialorder %v664_v25, 0.0 }
 0x3d9   :  { %v686_v14 = vmul.f32 1.442695, %v656_v7  ;;  %v659_v15 = vadd.f32 %v658_v29, %v568_v5  ;;  %vm674_vm1 = vcmp.gt.f32.partialorder %v656_v7, 0.0 }
 0x3da   :  { %1661 = vpow2.f32 %v690_v27  ;;  %v692_v30 = vmul.f32 1.442695, %v667_v28  ;;  %vm677_vm15 = vcmp.gt.f32.partialorder %v667_v28, 0.0 }
 0x3db   :  { %1663 = vpow2.f32 %v686_v14  ;;  %v688_v31 = vmul.f32 1.442695, %v659_v15  ;;  %vm675_vm2 = vcmp.gt.f32.partialorder %v659_v15, 0.0 }
 0x3dc   :  { %v1654_v32 = vpop.eup %1653  ;;  %1665 = vpow2.f32 %v692_v30 }
 0x3dd   :  { %v1656_v33 = vpop.eup %1655  ;;  %v1349_v34 = vadd.f32 -1.0, %v1654_v32  ;;  %1667 = vpow2.f32 %v688_v31 }
 0x3de   :  { %v1658_v35 = vpop.eup %1657  ;;  %v1347_v36 = vadd.f32 -1.0, %v1656_v33 }
 0x3df   :  { %v1660_v37 = vpop.eup %1659  ;;  %v1350_v38 = vadd.f32 -1.0, %v1658_v35  ;;  %v704_v40 = vsel %vm672_vm10, %v648_v9, %v1349_v34 }
 0x3e0   :  { %v1348_v39 = vadd.f32 -1.0, %v1660_v37  ;;  %v702_v42 = vsel %vm670_vm12, %v640_v11, %v1347_v36 }
 0x3e1   :  { %v705_v41 = vsel %vm673_vm11, %v651_v18, %v1350_v38 }
 0x3e2   :  { %v711_v43 = vpack.c.bf16 %v705_v41, %v704_v40  ;;  %v703_v44 = vsel %vm671_vm13, %v643_v21, %v1348_v39 }
 0x3e3   :  { %v710_v45 = vpack.c.bf16 %v703_v44, %v702_v42 }
 0x3e4   :  { %v1662_v46 = vpop.eup %1661 }
 0x3e5   :  { %v1664_v47 = vpop.eup %1663  ;;  %v1353_v48 = vadd.f32 -1.0, %v1662_v46  ;;  %1523 = vmatprep.mubr.msk.bf16.mxu0 %vm116_vm0, %v710_v45 }
 0x3e6   :  { %v1666_v49 = vpop.eup %1665  ;;  %v1351_v50 = vadd.f32 -1.0, %v1664_v47  ;;  %1524 = vmatmul.mubr.msk.bf16.vlgmr.msra.gmra.mrb[16].mxu0 %vm116_vm0, %v711_v43 }
 0x3e7   :  { %v1668_v51 = vpop.eup %1667  ;;  %v1354_v52 = vadd.f32 -1.0, %v1666_v49  ;;  %v708_v54 = vsel %vm676_vm14, %v664_v25, %v1353_v48 }
 0x3e8   :  { %v1352_v53 = vadd.f32 -1.0, %v1668_v51  ;;  %v706_v56 = vsel %vm674_vm1, %v656_v7, %v1351_v50 }
 0x3e9   :  { %v709_v55 = vsel %vm677_vm15, %v667_v28, %v1354_v52 }
 0x3ea   :  { %v713_v57 = vpack.c.bf16 %v709_v55, %v708_v54  ;;  %v707_v58 = vsel %vm675_vm2, %v659_v15, %v1352_v53 }
 0x3eb   :  { %v712_v59 = vpack.c.bf16 %v707_v58, %v706_v56  ;;  %v885_v58 = vsub.s32 5, %v1849_v13 }
 0x3ed   :  { %1527 = vmatprep.mubr.msk.bf16.mxu0 %vm116_vm0, %v712_v59  ;;  %v886_v59 = vrot.slane %v724_v1, %v885_v58 }
 0x3ee   :  { %1528 = vmatmul.mubr.msk.bf16.gmra.mrb[20].mxu0 %vm116_vm0, %v713_v57 }
 0x4b9   :  { %v1525_v4 = vpop.f32.mrb[16].mxu0 }
 0x4ba   :  { %v808_v5 = vadd.f32 %v1525_v4, %v728_v3  ;;  %v799_v8 = vpop.f32.mrb[17].mxu0 }
 0x4bb   :  { %v800_v9 = vadd.f32 %v799_v8, %v728_v3  ;;  %v1526_v10 = vpop.f32.mrb[18].mxu0 }
 0x4bc   :  { %v842_v11 = vmul.f32 1.442695, %v808_v5  ;;  %v811_v12 = vadd.f32 %v1526_v10, %v728_v3  ;;  %v802_v17 = vpop.f32.mrb[19].mxu0  ;;  %vm832_vm3 = vcmp.gt.f32.partialorder %v808_v5, 0.0 }
 0x4bd   :  { %v838_v18 = vmul.f32 1.442695, %v800_v9  ;;  %v803_v19 = vadd.f32 %v802_v17, %v728_v3  ;;  %vm830_vm5 = vcmp.gt.f32.partialorder %v800_v9, 0.0 }
 0x4be   :  { %1669 = vpow2.f32 %v842_v11  ;;  %v844_v20 = vmul.f32 1.442695, %v811_v12  ;;  %vm833_vm4 = vcmp.gt.f32.partialorder %v811_v12, 0.0 }
 0x4bf   :  { %1671 = vpow2.f32 %v838_v18  ;;  %v840_v21 = vmul.f32 1.442695, %v803_v19  ;;  %vm831_vm6 = vcmp.gt.f32.partialorder %v803_v19, 0.0 }
 0x4c0   :  { %1673 = vpow2.f32 %v844_v20 }
 0x4c1   :  { %1675 = vpow2.f32 %v840_v21  ;;  %v1529_v22 = vpop.f32.mrb[20].mxu0 }
 0x4c2   :  { %v824_v23 = vadd.f32 %v1529_v22, %v728_v3  ;;  %v815_v24 = vpop.f32.mrb[21].mxu0 }
 0x4c3   :  { %v816_v25 = vadd.f32 %v815_v24, %v728_v3  ;;  %v1530_v6 = vpop.f32.mrb[22].mxu0 }
 0x4c4   :  { %v850_v7 = vmul.f32 1.442695, %v824_v23  ;;  %v827_v26 = vadd.f32 %v1530_v6, %v728_v3  ;;  %v818_v27 = vpop.f32.mrb[23].mxu0  ;;  %vm836_vm7 = vcmp.gt.f32.partialorder %v824_v23, 0.0  ;;  %v1040_v6 = vld [vmem:[%s2020_s3] sm:$0x1] }
 0x4c5   :  { %v846_v28 = vmul.f32 1.442695, %v816_v25  ;;  %v819_v29 = vadd.f32 %v818_v27, %v728_v3  ;;  %vm834_vm9 = vcmp.gt.f32.partialorder %v816_v25, 0.0  ;;  %s1789_s3 = smov 96  }
 0x4c6   :  { %1677 = vpow2.f32 %v850_v7  ;;  %v852_v14 = vmul.f32 1.442695, %v827_v26  ;;  %vm837_vm8 = vcmp.gt.f32.partialorder %v827_v26, 0.0 }
 0x4c7   :  { %1679 = vpow2.f32 %v846_v28  ;;  %v848_v15 = vmul.f32 1.442695, %v819_v29  ;;  %vm835_vm10 = vcmp.gt.f32.partialorder %v819_v29, 0.0 }
 0x4c8   :  { %v1670_v30 = vpop.eup %1669  ;;  %1681 = vpow2.f32 %v852_v14  ;;  %v1041_v14 = vunpack.c.l.bf16 %v1040_v6 }
 0x4c9   :  { %v1672_v31 = vpop.eup %1671  ;;  %v1365_v32 = vadd.f32 -1.0, %v1670_v30  ;;  %1683 = vpow2.f32 %v848_v15 }
 0x4ca   :  { %v1674_v33 = vpop.eup %1673  ;;  %v1363_v34 = vadd.f32 -1.0, %v1672_v31 }
 0x4cb   :  { %v1676_v35 = vpop.eup %1675  ;;  %v1366_v36 = vadd.f32 -1.0, %v1674_v33  ;;  %v864_v38 = vsel %vm832_vm3, %v808_v5, %v1365_v32 }
 0x4cc   :  { %v1364_v37 = vadd.f32 -1.0, %v1676_v35  ;;  %v862_v40 = vsel %vm830_vm5, %v800_v9, %v1363_v34 }
 0x4cd   :  { %v865_v39 = vsel %vm833_vm4, %v811_v12, %v1366_v36 }
 0x4ce   :  { %v871_v41 = vpack.c.bf16 %v865_v39, %v864_v38  ;;  %v863_v42 = vsel %vm831_vm6, %v803_v19, %v1364_v37  ;;  %v1045_v37 = vrot.slane %v1041_v14, %v70_v16 }
 0x4cf   :  { %v870_v43 = vpack.c.bf16 %v863_v42, %v862_v40 }
 0x4d0   :  { %v1678_v44 = vpop.eup %1677 }
 0x4d1   :  { %v1680_v45 = vpop.eup %1679  ;;  %v1369_v46 = vadd.f32 -1.0, %v1678_v44  ;;  %1539 = vmatprep.mubr.msk.bf16.mxu1 %vm116_vm0, %v870_v43 }
 0x4d2   :  { %v1682_v47 = vpop.eup %1681  ;;  %v1367_v48 = vadd.f32 -1.0, %v1680_v45  ;;  %1540 = vmatmul.mubr.msk.bf16.vlgmr.msra.gmra.mrb[16].mxu1 %vm116_vm0, %v871_v41 }
 0x4d3   :  { %v1684_v49 = vpop.eup %1683  ;;  %v1370_v50 = vadd.f32 -1.0, %v1682_v47  ;;  %v868_v52 = vsel %vm836_vm7, %v824_v23, %v1369_v46 }
 0x4d4   :  { %v1368_v51 = vadd.f32 -1.0, %v1684_v49  ;;  %v866_v54 = vsel %vm834_vm9, %v816_v25, %v1367_v48 }
 0x4d5   :  { %v869_v53 = vsel %vm837_vm8, %v827_v26, %v1370_v50 }
 0x4d6   :  { %v873_v55 = vpack.c.bf16 %v869_v53, %v868_v52  ;;  %v867_v56 = vsel %vm835_vm10, %v819_v29, %v1368_v51 }
 0x4d7   :  { %v872_v57 = vpack.c.bf16 %v867_v56, %v866_v54 }
 0x4d9   :  { %1543 = vmatprep.mubr.msk.bf16.mxu1 %vm116_vm0, %v872_v57 }
 0x4da   :  { %1544 = vmatmul.mubr.msk.bf16.gmra.mrb[20].mxu1 %vm116_vm0, %v873_v55 }
 0x5a5   :  { %v1541_v60 = vpop.f32.mrb[16].mxu1 }
 0x5a6   :  { %v966_v61 = vadd.f32 %v1541_v60, %v886_v59  ;;  %v957_v62 = vpop.f32.mrb[17].mxu1 }
 0x5a7   :  { %v958_v63 = vadd.f32 %v957_v62, %v886_v59  ;;  %v1542_v2 = vpop.f32.mrb[18].mxu1 }
 0x5a8   :  { %v1000_v3 = vmul.f32 1.442695, %v966_v61  ;;  %v969_v4 = vadd.f32 %v1542_v2, %v886_v59  ;;  %v960_v5 = vpop.f32.mrb[19].mxu1  ;;  %vm990_vm11 = vcmp.gt.f32.partialorder %v966_v61, 0.0 }
 0x5a9   :  { %v996_v8 = vmul.f32 1.442695, %v958_v63  ;;  %v961_v9 = vadd.f32 %v960_v5, %v886_v59  ;;  %vm988_vm13 = vcmp.gt.f32.partialorder %v958_v63, 0.0 }
 0x5aa   :  { %1685 = vpow2.f32 %v1000_v3  ;;  %v1002_v10 = vmul.f32 1.442695, %v969_v4  ;;  %vm991_vm12 = vcmp.gt.f32.partialorder %v969_v4, 0.0 }
 0x5ab   :  { %1687 = vpow2.f32 %v996_v8  ;;  %v998_v11 = vmul.f32 1.442695, %v961_v9  ;;  %vm989_vm14 = vcmp.gt.f32.partialorder %v961_v9, 0.0 }
 0x5ac   :  { %1689 = vpow2.f32 %v1002_v10 }
 0x5ad   :  { %1691 = vpow2.f32 %v998_v11  ;;  %v1545_v12 = vpop.f32.mrb[20].mxu1 }
 0x5ae   :  { %v982_v17 = vadd.f32 %v1545_v12, %v886_v59  ;;  %v973_v0 = vpop.f32.mrb[21].mxu1 }
 0x5af   :  { %v974_v1 = vadd.f32 %v973_v0, %v886_v59  ;;  %v1546_v18 = vpop.f32.mrb[22].mxu1 }
 0x5b0   :  { %v1008_v19 = vmul.f32 1.442695, %v982_v17  ;;  %v985_v20 = vadd.f32 %v1546_v18, %v886_v59  ;;  %v976_v21 = vpop.f32.mrb[23].mxu1  ;;  %vm994_vm15 = vcmp.gt.f32.partialorder %v982_v17, 0.0 }
 0x5b1   :  { %v1004_v22 = vmul.f32 1.442695, %v974_v1  ;;  %v977_v23 = vadd.f32 %v976_v21, %v886_v59  ;;  %vm992_vm1 = vcmp.gt.f32.partialorder %v974_v1, 0.0  ;;  %v1734_v21 = vld [vmem:[#allocation3 + $0x10] sm:$0xff]  }
 0x5b2   :  { %1693 = vpow2.f32 %v1008_v19  ;;  %v1010_v24 = vmul.f32 1.442695, %v985_v20  ;;  %vm995_vm2 = vcmp.gt.f32.partialorder %v985_v20, 0.0 }
 0x5b3   :  { %1695 = vpow2.f32 %v1004_v22  ;;  %v1006_v25 = vmul.f32 1.442695, %v977_v23  ;;  %vm993_vm3 = vcmp.gt.f32.partialorder %v977_v23, 0.0  ;;  %v1928_v22 = vunpack.c.l.bf16 %v1734_v21 }
 0x5b4   :  { %v1686_v7 = vpop.eup %1685  ;;  %1697 = vpow2.f32 %v1010_v24  ;;  %v1735_v24 = vld [vmem:[#allocation3] sm:$0xff]  }
 0x5b5   :  { %v1688_v26 = vpop.eup %1687  ;;  %v1381_v27 = vadd.f32 -1.0, %v1686_v7  ;;  %1699 = vpow2.f32 %v1006_v25  ;;  %v1932_v25 = vunpack.c.l.bf16 %v1735_v24  ;;  %v1934_v6 = vunpack.c.h.bf16 %v1735_v24 }
 0x5b6   :  { %v1690_v28 = vpop.eup %1689  ;;  %v1379_v29 = vadd.f32 -1.0, %v1688_v26  ;;  %v1736_v26 = vld [vmem:[#allocation3 + $0x18] sm:$0xff]  }
 0x5b7   :  { %v1692_v15 = vpop.eup %1691  ;;  %v1382_v30 = vadd.f32 -1.0, %v1690_v28  ;;  %v1022_v32 = vsel %vm990_vm11, %v966_v61, %v1381_v27  ;;  %v1939_v27 = vunpack.c.l.bf16 %v1736_v26  ;;  %v1941_v28 = vunpack.c.h.bf16 %v1736_v26 }
 0x5b8   :  { %v1380_v31 = vadd.f32 -1.0, %v1692_v15  ;;  %v1020_v34 = vsel %vm988_vm13, %v958_v63, %v1379_v29  ;;  %v1553_v29 = vpack.i.bf16 %v1934_v6, %v1932_v25  ;;  %v1079_v15 = vstv %s2021_s4  ;;  %s1790_s4 = smov 32  }
 0x5b9   :  { %v1023_v33 = vsel %vm991_vm12, %v969_v4, %v1382_v30  ;;  %v1568_v14 = vpack.i.bf16 %v1941_v28, %v1939_v27 }
 0x5ba   :  { %v1021_v35 = vsel %vm989_vm14, %v961_v9, %v1380_v31  ;;  %v1029_v36 = vpack.c.bf16 %v1023_v33, %v1022_v32 }
 0x5bb   :  { %v1028_v38 = vpack.c.bf16 %v1021_v35, %v1020_v34 }
 0x5bc   :  { %v1694_v39 = vpop.eup %1693  ;;  %v1034_v40 = vunpack.c.l.bf16 %v1029_v36  ;;  %v1035_v41 = vunpack.c.h.bf16 %v1029_v36 }
 0x5bd   :  { %v1696_v42 = vpop.eup %1695  ;;  %v1385_v43 = vadd.f32 -1.0, %v1694_v39  ;;  %v1032_v44 = vunpack.c.l.bf16 %v1028_v38  ;;  %v1033_v45 = vunpack.c.h.bf16 %v1028_v38 }
 0x5be   :  { %v1698_v46 = vpop.eup %1697  ;;  %v1383_v47 = vadd.f32 -1.0, %v1696_v42  ;;  %v1048_v48 = vmul.f32 %v1045_v37, %v1034_v40  ;;  %v1049_v52 = vmul.f32 %v1045_v37, %v1035_v41 }
 0x5bf   :  { %v1700_v49 = vpop.eup %1699  ;;  %v1386_v50 = vadd.f32 -1.0, %v1698_v46  ;;  %v1046_v51 = vmul.f32 %v1045_v37, %v1032_v44  ;;  %v1026_v53 = vsel %vm994_vm15, %v982_v17, %v1385_v43  ;;  %v1047_v56 = vmul.f32 %v1045_v37, %v1033_v45 }
 0x5c0   :  { %v1384_v13 = vadd.f32 -1.0, %v1700_v49  ;;  %v1060_v16 = vsel %vm116_vm0, %v1048_v48, 0.0  ;;  %v1024_v57 = vsel %vm992_vm1, %v974_v1, %v1383_v47  ;;  %v1063_v61 = vsel %vm116_vm0, %v1049_v52, 0.0  ;;  %v1733_v1 = vld [vmem:[#allocation3 + $0x8] sm:$0xff]  }
 0x5c1   :  { %v1027_v54 = vsel %vm995_vm2, %v985_v20, %v1386_v50  ;;  %1061 = vadd.xlane.f32.xlu1 %v1060_v16  ;;  %v1054_v55 = vsel %vm116_vm0, %v1046_v51, 0.0  ;;  %v1057_v63 = vsel %vm116_vm0, %v1047_v56, 0.0  ;;  %v1922_v18 = vunpack.c.l.bf16 %v1733_v1 }
 0x5c2   :  { %v1031_v58 = vpack.c.bf16 %v1027_v54, %v1026_v53  ;;  %v1025_v59 = vsel %vm993_vm3, %v977_v23, %v1384_v13  ;;  %1055 = vadd.xlane.f32.xlu0 %v1054_v55  ;;  %v1924_v19 = vunpack.c.h.bf16 %v1733_v1  ;;  %v1930_v23 = vunpack.c.h.bf16 %v1734_v21 }
 0x5c3   :  { %v1030_v60 = vpack.c.bf16 %v1025_v59, %v1024_v57 }
 0x5c4   :  { %v1039_v62 = vunpack.c.h.bf16 %v1031_v58  ;;  %v1038_v4 = vunpack.c.l.bf16 %v1031_v58  ;;  %v1558_v20 = vpack.i.bf16 %v1924_v19, %v1922_v18  ;;  %v1563_v7 = vpack.i.bf16 %v1930_v23, %v1928_v22 }
 0x5c5   :  { %1064 = vadd.xlane.f32.xlu1 %v1063_v61  ;;  %v1036_v2 = vunpack.c.l.bf16 %v1030_v60  ;;  %v1037_v3 = vunpack.c.h.bf16 %v1030_v60 }
 0x5c6   :  { %1058 = vadd.xlane.f32.xlu0 %v1057_v63  ;;  %v1053_v5 = vmul.f32 %v1045_v37, %v1039_v62  ;;  %v1052_v12 = vmul.f32 %v1045_v37, %v1038_v4 }
 0x5c7   :  { %v1050_v8 = vmul.f32 %v1045_v37, %v1036_v2  ;;  %v1051_v10 = vmul.f32 %v1045_v37, %v1037_v3 }
 0x5c8   :  { %v1075_v9 = vsel %vm116_vm0, %v1053_v5, 0.0  ;;  %v1072_v0 = vsel %vm116_vm0, %v1052_v12, 0.0 }
 0x5c9   :  { %1076 = vadd.xlane.f32.xlu1 %v1075_v9  ;;  %v1066_v11 = vsel %vm116_vm0, %v1050_v8, 0.0  ;;  %v1069_v17 = vsel %vm116_vm0, %v1051_v10, 0.0  ;;  %vm1272_vm0 = vcmask 257024  }
 0x5ca   :  { %1067 = vadd.xlane.f32.xlu0 %v1066_v11 }
 0x5cd   :  { %1070 = vadd.xlane.f32.xlu1 %v1069_v17 }
 0x5ce   :  { %1073 = vadd.xlane.f32.xlu0 %v1072_v0 }
 0x5de   :  { %1559 = vrot.lane.b32.xlu1 %v1558_v20, %s1789_s3 }
 0x5e2   :  { %1564 = vrot.lane.b32.xlu1 %v1563_v7, %s1789_s3 }
 0x5e4   :  { %1554 = vrot.lane.b32.xlu0 %v1553_v29, %s1789_s3 }
 0x5e6   :  { %1569 = vrot.lane.b32.xlu1 %v1568_v14, %s1789_s3 }
 0x64e   :  { %v1062_v30 = vpop.xlane.xlu1 %1061 }
 0x64f   :  { %v1082_v31 = vadd.f32 %v1079_v15, %v1062_v30  ;;  %v1056_v32 = vpop.xlane.xlu0 %1055 }
 0x650   :  { %v1080_v33 = vadd.f32 %v1079_v15, %v1056_v32 }
 0x651   :  { %v1090_v34 = vsub.f32 0.0, %v1082_v31 }
 0x652   :  { %v1088_v35 = vsub.f32 0.0, %v1080_v33  ;;  %v1065_v36 = vpop.xlane.xlu1 %1064 }
 0x653   :  { %v1100_v37 = vmul.f32 1.442695, %v1090_v34  ;;  %v1083_v38 = vadd.f32 %v1079_v15, %v1065_v36  ;;  %v1059_v39 = vpop.xlane.xlu0 %1058 }
 0x654   :  { %v1096_v40 = vmul.f32 1.442695, %v1088_v35  ;;  %v1081_v41 = vadd.f32 %v1079_v15, %v1059_v39 }
 0x655   :  { %1701 = vpow2.f32 %v1100_v37  ;;  %v1091_v42 = vsub.f32 0.0, %v1083_v38 }
 0x656   :  { %1703 = vpow2.f32 %v1096_v40  ;;  %v1089_v43 = vsub.f32 0.0, %v1081_v41  ;;  %v1077_v44 = vpop.xlane.xlu1 %1076 }
 0x657   :  { %v1102_v45 = vmul.f32 1.442695, %v1091_v42  ;;  %v1087_v46 = vadd.f32 %v1079_v15, %v1077_v44  ;;  %v1068_v47 = vpop.xlane.xlu0 %1067 }
 0x658   :  { %v1098_v48 = vmul.f32 1.442695, %v1089_v43  ;;  %v1084_v49 = vadd.f32 %v1079_v15, %v1068_v47 }
 0x659   :  { %1705 = vpow2.f32 %v1102_v45  ;;  %v1095_v50 = vsub.f32 0.0, %v1087_v46 }
 0x65a   :  { %1707 = vpow2.f32 %v1098_v48  ;;  %v1092_v51 = vsub.f32 0.0, %v1084_v49  ;;  %v1071_v13 = vpop.xlane.xlu1 %1070 }
 0x65b   :  { %v1110_v16 = vmul.f32 1.442695, %v1095_v50  ;;  %v1085_v52 = vadd.f32 %v1079_v15, %v1071_v13  ;;  %v1074_v53 = vpop.xlane.xlu0 %1073 }
 0x65c   :  { %v1104_v54 = vmul.f32 1.442695, %v1092_v51  ;;  %v1086_v55 = vadd.f32 %v1079_v15, %v1074_v53 }
 0x65d   :  { %v1093_v56 = vsub.f32 0.0, %v1085_v52 }
 0x65e   :  { %1709 = vpow2.f32 %v1104_v54  ;;  %v1094_v57 = vsub.f32 0.0, %v1086_v55  ;;  %v1560_v2 = vpop.permute.xlu1 %1559 }
 0x65f   :  { %v1702_v58 = vpop.eup %1701  ;;  %1711 = vpow2.f32 %v1110_v16  ;;  %v1106_v59 = vmul.f32 1.442695, %v1093_v56  ;;  %v1561_v9 = vunpack.i.l.bf16 %v1560_v2  ;;  %v1555_v10 = vpop.permute.xlu0 %1554  ;;  %v1562_v0 = vunpack.i.h.bf16 %v1560_v2 }
 0x660   :  { %v1704_v60 = vpop.eup %1703  ;;  %v1114_v61 = vadd.f32 1.0, %v1702_v58  ;;  %v1108_v62 = vmul.f32 1.442695, %v1094_v57  ;;  %v1556_v20 = vunpack.i.l.bf16 %v1555_v10  ;;  %v1557_v29 = vunpack.i.h.bf16 %v1555_v10 }
 0x661   :  { %v1112_v63 = vadd.f32 1.0, %v1704_v60  ;;  %1713 = vpow2.f32 %v1106_v59  ;;  %v1170_v1 = vsub.f32 %v1922_v18, %v1561_v9  ;;  %v1171_v30 = vsub.f32 %v1924_v19, %v1562_v0 }
 0x662   :  { %1715 = vrcp.f32 %v1114_v61  ;;  %v1565_v14 = vpop.permute.xlu1 %1564  ;;  %v1168_v31 = vsub.f32 %v1932_v25, %v1556_v20  ;;  %v1169_v37 = vsub.f32 %v1934_v6, %v1557_v29 }
 0x663   :  { %v1706_v3 = vpop.eup %1705  ;;  %1717 = vrcp.f32 %v1112_v63  ;;  %v1566_v34 = vunpack.i.l.bf16 %v1565_v14  ;;  %v1567_v38 = vunpack.i.h.bf16 %v1565_v14 }
 0x664   :  { %v1708_v4 = vpop.eup %1707  ;;  %v1115_v5 = vadd.f32 1.0, %v1706_v3  ;;  %1719 = vpow2.f32 %v1108_v62 }
 0x665   :  { %v1113_v8 = vadd.f32 1.0, %v1708_v4  ;;  %v1172_v42 = vsub.f32 %v1928_v22, %v1566_v34  ;;  %v1173_v46 = vsub.f32 %v1930_v23, %v1567_v38 }
 0x666   :  { %1721 = vrcp.f32 %v1115_v5  ;;  %v1570_v43 = vpop.permute.xlu1 %1569 }
 0x667   :  { %1723 = vrcp.f32 %v1113_v8  ;;  %v1571_v44 = vunpack.i.l.bf16 %v1570_v43  ;;  %v1572_v47 = vunpack.i.h.bf16 %v1570_v43 }
 0x668   :  { %v1710_v11 = vpop.eup %1709 }
 0x669   :  { %v1712_v12 = vpop.eup %1711  ;;  %v1116_v17 = vadd.f32 1.0, %v1710_v11  ;;  %v1174_v51 = vsub.f32 %v1939_v27, %v1571_v44  ;;  %v1175_v13 = vsub.f32 %v1941_v28, %v1572_v47 }
 0x66a   :  { %v1119_v7 = vadd.f32 1.0, %v1712_v12 }
 0x66b   :  { %v1714_v21 = vpop.eup %1713  ;;  %1725 = vrcp.f32 %v1116_v17 }
 0x66c   :  { %v1716_v24 = vpop.eup %1715  ;;  %v1117_v26 = vadd.f32 1.0, %v1714_v21 }
 0x66d   :  { %v1718_v15 = vpop.eup %1717  ;;  %v1178_v32 = vmul.f32 %v1716_v24, %v1170_v1 }
 0x66e   :  { %v1720_v33 = vpop.eup %1719  ;;  %1727 = vrcp.f32 %v1117_v26  ;;  %v1176_v40 = vmul.f32 %v1718_v15, %v1168_v31 }
 0x66f   :  { %v1118_v35 = vadd.f32 1.0, %v1720_v33  ;;  %1196 = vrot.lane.b32.xlu0 %v1178_v32, %s1790_s4  ;;  %1729 = vrcp.f32 %v1119_v7 }
 0x670   :  { %v1722_v36 = vpop.eup %1721 }
 0x671   :  { %1731 = vrcp.f32 %v1118_v35  ;;  %v1179_v39 = vmul.f32 %v1722_v36, %v1171_v30  ;;  %v1724_v41 = vpop.eup %1723 }
 0x672   :  { %v1177_v48 = vmul.f32 %v1724_v41, %v1169_v37 }
 0x673   :  { %1198 = vrot.lane.b32.xlu1 %v1179_v39, %s1790_s4  ;;  %1192 = vrot.lane.b32.xlu0 %v1176_v40, %s1790_s4 }
 0x675   :  { %v1726_v45 = vpop.eup %1725 }
 0x676   :  { %v1180_v49 = vmul.f32 %v1726_v45, %v1172_v42 }
 0x677   :  { %1194 = vrot.lane.b32.xlu1 %v1177_v48, %s1790_s4 }
 0x678   :  { %v1728_v50 = vpop.eup %1727  ;;  %1200 = vrot.lane.b32.xlu0 %v1180_v49, %s1790_s4 }
 0x679   :  { %v1181_v16 = vmul.f32 %v1728_v50, %v1173_v46  ;;  %v1730_v52 = vpop.eup %1729 }
 0x67a   :  { %v1183_v55 = vmul.f32 %v1730_v52, %v1175_v13 }
 0x67b   :  { %v1732_v53 = vpop.eup %1731  ;;  %1202 = vrot.lane.b32.xlu1 %v1181_v16, %s1790_s4 }
 0x67c   :  { %v1182_v54 = vmul.f32 %v1732_v53, %v1174_v51 }
 0x67e   :  { %1204 = vrot.lane.b32.xlu0 %v1182_v54, %s1790_s4 }
 0x67f   :  { %1206 = vrot.lane.b32.xlu1 %v1183_v55, %s1790_s4 }
 0x6e1   :  { %v1197_v56 = vpop.permute.xlu0 %1196 }
 0x6e2   :  { %v1218_v57 = vadd.f32 %v1197_v56, %v1922_v18 }
 0x6e4   :  { %v1397_v58 = vpack.c.bf16 %v1218_v57, %v1218_v57 }
 0x6e5   :  { %v1199_v59 = vpop.permute.xlu1 %1198  ;;  %v1193_v60 = vpop.permute.xlu0 %1192 }
 0x6e6   :  { %v1219_v61 = vadd.f32 %v1199_v59, %v1924_v19  ;;  %v1216_v62 = vadd.f32 %v1193_v60, %v1932_v25  ;;  %1252 = vrot.lane.b32.xlu0 %v1397_v58, %s1789_s3 }
 0x6e8   :  { %v1398_v63 = vpack.c.bf16 %v1219_v61, %v1219_v61  ;;  %v1395_v2 = vpack.c.bf16 %v1216_v62, %v1216_v62 }
 0x6e9   :  { %v1195_v3 = vpop.permute.xlu1 %1194 }
 0x6ea   :  { %v1217_v4 = vadd.f32 %v1195_v3, %v1934_v6  ;;  %1254 = vrot.lane.b32.xlu1 %v1398_v63, %s1789_s3  ;;  %1248 = vrot.lane.b32.xlu0 %v1395_v2, %s1789_s3  ;;  %v1201_v5 = vpop.permute.xlu0 %1200 }
 0x6eb   :  { %v1220_v18 = vadd.f32 %v1201_v5, %v1928_v22 }
 0x6ec   :  { %v1396_v8 = vpack.c.bf16 %v1217_v4, %v1217_v4 }
 0x6ed   :  { %v1399_v9 = vpack.c.bf16 %v1220_v18, %v1220_v18  ;;  %v1203_v10 = vpop.permute.xlu1 %1202 }
 0x6ee   :  { %v1221_v19 = vadd.f32 %v1203_v10, %v1930_v23  ;;  %1250 = vrot.lane.b32.xlu1 %v1396_v8, %s1789_s3 }
 0x6ef   :  { %1256 = vrot.lane.b32.xlu0 %v1399_v9, %s1789_s3 }
 0x6f0   :  { %v1400_v25 = vpack.c.bf16 %v1221_v19, %v1221_v19  ;;  %v1205_v11 = vpop.permute.xlu0 %1204 }
 0x6f1   :  { %v1222_v6 = vadd.f32 %v1205_v11, %v1939_v27  ;;  %v1207_v12 = vpop.permute.xlu1 %1206 }
 0x6f2   :  { %v1223_v17 = vadd.f32 %v1207_v12, %v1941_v28  ;;  %1258 = vrot.lane.b32.xlu1 %v1400_v25, %s1789_s3 }
 0x6f3   :  { %v1401_v0 = vpack.c.bf16 %v1222_v6, %v1222_v6 }
 0x6f4   :  { %v1402_v22 = vpack.c.bf16 %v1223_v17, %v1223_v17 }
 0x6f5   :  { %1260 = vrot.lane.b32.xlu0 %v1401_v0, %s1789_s3 }
 0x6f6   :  { %1262 = vrot.lane.b32.xlu1 %v1402_v22, %s1789_s3 }
 0x758   :  { %v1253_v23 = vpop.permute.xlu0 %1252 }
 0x759   :  { %1275 = vst.msk [vmem:[%s2022_s5 + $0x8] sm:$0xf] %vm1272_vm0, %v1253_v23 }
 0x75c   :  { %v1255_v1 = vpop.permute.xlu1 %1254  ;;  %v1249_v27 = vpop.permute.xlu0 %1248 }
 0x75d   :  { %1276 = vst.msk [vmem:[%s2022_s5 + $0xc] sm:$0xf] %vm1272_vm0, %v1255_v1  ;;  %1273 = vst.msk [vmem:[%s2022_s5] sm:$0xf] %vm1272_vm0, %v1249_v27 }
 0x760   :  { %v1251_v28 = vpop.permute.xlu1 %1250 }
 0x761   :  { %1274 = vst.msk [vmem:[%s2022_s5 + $0x4] sm:$0xf] %vm1272_vm0, %v1251_v28  ;;  %v1257_v20 = vpop.permute.xlu0 %1256 }
 0x762   :  { %1277 = vst.msk [vmem:[%s2022_s5 + $0x10] sm:$0xf] %vm1272_vm0, %v1257_v20 }
 0x764   :  { %v1259_v21 = vpop.permute.xlu1 %1258 }
 0x765   :  { %1278 = vst.msk [vmem:[%s2022_s5 + $0x14] sm:$0xf] %vm1272_vm0, %v1259_v21 }
 0x767   :  { %v1261_v24 = vpop.permute.xlu0 %1260 }
 0x768   :  { %1279 = vst.msk [vmem:[%s2022_s5 + $0x18] sm:$0xf] %vm1272_vm0, %v1261_v24  ;;  %v1263_v7 = vpop.permute.xlu1 %1262 }
 0x769   :  { %1280 = vst.msk [vmem:[%s2022_s5 + $0x1c] sm:$0xf] %vm1272_vm0, %v1263_v7 }
 0x76a   :  { %1285 = vsyncpa [#allocation4], 1 }
 0x76b   :  { %1286 = vsyncpa [#allocation6], 1 }

</bundles_post_ra>
